<compile_context>
chip_gen: v7x
topology: tpu7x:2x2x1
jax: 0.10.0
libtpu: 0.0.40
codegen_flags: <defaults>
</compile_context>

<pallas_src>
import functools

import jax
import jax.numpy as jnp
from jax.experimental import pallas as pl
from jax.experimental.pallas import tpu as pltpu


def _round_up(x, m):
    return ((x + m - 1) // m) * m


def _graph_fused_kernel(x_ref, ahat_ref, w_ref, b_ref, o_ref, *, n_layers):
    # x_ref:    (B, N, Dp)   padded input activations (f32)
    # ahat_ref: (B, N, N)    adjacency with identity folded in (A + I)
    # w_ref:    (L, Dp, Dp)  zero-padded, stacked layer weights
    # b_ref:    (L, 1, Dp)   zero-padded, stacked layer biases
    # o_ref:    (B, N, Dp)   padded output activations
    B, N, Dp = x_ref.shape
    BN = B * N

    a_hat = ahat_ref[...]                              # (B, N, N), loaded once
    x = x_ref[...].reshape(BN, Dp)                     # fold batch into rows

    for l in range(n_layers):                          # static unroll, L is tiny
        # support = X @ W  -- one lane-dense (BN, Dp) @ (Dp, Dp) MXU matmul
        support = jnp.dot(x, w_ref[l], preferred_element_type=jnp.float32)
        # out = (A + I) @ support  (folds the skip connection), batched over B
        out = jnp.einsum(
            "bnm,bme->bne",
            a_hat,
            support.reshape(B, N, Dp),
            preferred_element_type=jnp.float32,
        )
        out = out.reshape(BN, Dp) + b_ref[l]           # bias (1, Dp) broadcast
        x = jnp.maximum(out, 0.0)                      # ReLU

    o_ref[...] = x.reshape(B, N, Dp).astype(o_ref.dtype)


def graph_forward_fused(X, A, params):
    """Full multi-layer Graph forward in one pallas_call."""
    B, N, in_dim = X.shape
    L = len(params)
    out_dim = params[-1][0].shape[1]

    # Lane-dense padded feature width shared by every layer.
    all_dims = [in_dim] + [w.shape[0] for (w, _) in params] + [w.shape[1] for (w, _) in params]
    Dp = _round_up(max(all_dims + [128]), 128)

    # Zero-pad activations / weights / biases; zero padding propagates as zeros
    # through matmul + bias + relu, so results in the real columns are exact.
    X_pad = jnp.zeros((B, N, Dp), jnp.float32).at[:, :, :in_dim].set(X.astype(jnp.float32))

    # Fold the skip connection into the adjacency.
    A_hat = A.astype(jnp.float32) + jnp.eye(N, dtype=jnp.float32)[None]

    W_all = jnp.zeros((L, Dp, Dp), jnp.float32)
    B_all = jnp.zeros((L, 1, Dp), jnp.float32)
    for l, (w, b) in enumerate(params):
        din, dout = w.shape
        W_all = W_all.at[l, :din, :dout].set(w.astype(jnp.float32))
        B_all = B_all.at[l, 0, :dout].set(b.astype(jnp.float32))

    kernel = functools.partial(_graph_fused_kernel, n_layers=L)

    out_pad = pl.pallas_call(
        kernel,
        out_shape=jax.ShapeDtypeStruct((B, N, Dp), jnp.float32),
        grid_spec=pltpu.PrefetchScalarGridSpec(
            num_scalar_prefetch=0,
            grid=(1,),
            in_specs=[
                pl.BlockSpec((B, N, Dp), lambda i: (0, 0, 0)),
                pl.BlockSpec((B, N, N), lambda i: (0, 0, 0)),
                pl.BlockSpec((L, Dp, Dp), lambda i: (0, 0, 0)),
                pl.BlockSpec((L, 1, Dp), lambda i: (0, 0, 0)),
            ],
            out_specs=pl.BlockSpec((B, N, Dp), lambda i: (0, 0, 0)),
        ),
        compiler_params=pltpu.CompilerParams(
            dimension_semantics=("arbitrary",),
        ),
    )(X_pad, A_hat, W_all, B_all)

    return out_pad[:, :, :out_dim]


def init_graph_params(key, in_dim, hidden_dim, out_dim, n_layers):
    """Deterministic parameter init mirroring Graph.__init__ layer structure."""
    hidden = out_dim if n_layers == 1 else hidden_dim
    dims = [(in_dim, hidden)]
    for i in range(n_layers - 1):
        temp = out_dim if i == n_layers - 2 else hidden_dim
        dims.append((hidden_dim, temp))

    params = []
    for (din, dout) in dims:
        key, kw, kb = jax.random.split(key, 3)
        w = jax.random.normal(kw, (din, dout), dtype=jnp.float32) * 0.1
        b = jax.random.normal(kb, (dout,), dtype=jnp.float32) * 0.01
        params.append((w, b))
    return params


@jax.jit
def graph_forward(X, A, params):
    return graph_forward_fused(X, A, params)


if __name__ == "__main__":
    # Small shapes consistent with the module.
    B, N = 2, 8
    in_dim, hidden_dim, out_dim, n_layers = 16, 32, 16, 2

    key = jax.random.PRNGKey(0)
    kx, ka, kp = jax.random.split(key, 3)

    X = jax.random.normal(kx, (B, N, in_dim), dtype=jnp.float32)
    # Row-stochastic adjacency (as build_graph's softmax would produce).
    A_logits = jax.random.normal(ka, (B, N, N), dtype=jnp.float32)
    A = jax.nn.softmax(A_logits, axis=2)

    params = tuple(init_graph_params(kp, in_dim, hidden_dim, out_dim, n_layers))

    out = graph_forward(X, A, params)
    jax.block_until_ready(out)

    # Reference check in plain JAX (same math as the PyTorch module).
    def ref(X, A, params):
        x = X
        for (w, b) in params:
            support = jnp.einsum("bnd,de->bne", x, w)
            o = jnp.einsum("bnm,bme->bne", A, support) + b[None, None, :] + support
            x = jnp.maximum(o, 0.0)
        return x

    ref_out = ref(X, A, params)
    assert out.shape == (B, N, out_dim)
    assert jnp.allclose(out, ref_out, atol=1e-4, rtol=1e-4)

    print("KERNEL_OK")
</pallas_src>

<mosaic_0001>
module attributes {stable_mosaic.version = 11 : i64} {
  func.func @_graph_fused_kernel(%arg0: i32, %arg1: memref<2x8x128xf32, #tpu.memory_space<vmem>>, %arg2: memref<2x8x8xf32, #tpu.memory_space<vmem>>, %arg3: memref<2x128x128xf32, #tpu.memory_space<vmem>>, %arg4: memref<2x1x128xf32, #tpu.memory_space<vmem>>, %arg5: memref<2x8x128xf32, #tpu.memory_space<vmem>>) attributes {dimension_semantics = [#tpu.dimension_semantics<arbitrary>], iteration_bounds = array<i64: 1>, scalar_prefetch = 0 : i64, scratch_operands = 0 : i64, tpu.core_type = #tpu.core_type<tc>, window_params = [{pipeline_mode = #tpu.pipeline_mode<synchronous>, transform_indices = @transform_0, window_bounds = array<i64: 2, 8, 128>}, {pipeline_mode = #tpu.pipeline_mode<synchronous>, transform_indices = @transform_1, window_bounds = array<i64: 2, 8, 8>}, {pipeline_mode = #tpu.pipeline_mode<synchronous>, transform_indices = @transform_2, window_bounds = array<i64: 2, 128, 128>}, {pipeline_mode = #tpu.pipeline_mode<synchronous>, transform_indices = @transform_3, window_bounds = array<i64: 2, 1, 128>}, {pipeline_mode = #tpu.pipeline_mode<synchronous>, transform_indices = @transform_4, window_bounds = array<i64: 2, 8, 128>}]} {
    %c0 = arith.constant 0 : index
    %c0_0 = arith.constant 0 : index
    %c0_1 = arith.constant 0 : index
    %0 = vector.load %arg2[%c0, %c0_0, %c0_1] : memref<2x8x8xf32, #tpu.memory_space<vmem>>, vector<2x8x8xf32>
    %c0_2 = arith.constant 0 : index
    %c0_3 = arith.constant 0 : index
    %c0_4 = arith.constant 0 : index
    %1 = vector.load %arg1[%c0_2, %c0_3, %c0_4] : memref<2x8x128xf32, #tpu.memory_space<vmem>>, vector<2x8x128xf32>
    %2 = vector.shape_cast %1 : vector<2x8x128xf32> to vector<16x128xf32>
    %c0_5 = arith.constant 0 : index
    %c0_6 = arith.constant 0 : index
    %c0_7 = arith.constant 0 : index
    %3 = vector.load %arg3[%c0_5, %c0_6, %c0_7] : memref<2x128x128xf32, #tpu.memory_space<vmem>>, vector<1x128x128xf32>
    %4 = vector.shape_cast %3 : vector<1x128x128xf32> to vector<128x128xf32>
    %cst = arith.constant dense<0.000000e+00> : vector<16x128xf32>
    %5 = tpu.matmul %2, %4, %cst {dimension_numbers = #tpu.dot_dimension_numbers<[1], [0], [0], [1], [0, 0, 1, 1], [], []>} : vector<16x128xf32>, vector<128x128xf32>, vector<16x128xf32> -> vector<16x128xf32>
    %6 = vector.shape_cast %5 : vector<16x128xf32> to vector<2x8x128xf32>
    "tpu.trace_start"() <{level = 10 : i32, message = "bnm,bme->bne"}> : () -> ()
    %cst_8 = arith.constant dense<0.000000e+00> : vector<2x8x128xf32>
    %7 = tpu.matmul %0, %6, %cst_8 {dimension_numbers = #tpu.dot_dimension_numbers<[2], [1], [1], [2], [0, 0, 0, 1, 1, 2], [0], [0]>} : vector<2x8x8xf32>, vector<2x8x128xf32>, vector<2x8x128xf32> -> vector<2x8x128xf32>
    "tpu.trace_stop"() : () -> ()
    %8 = vector.shape_cast %7 : vector<2x8x128xf32> to vector<16x128xf32>
    %c0_9 = arith.constant 0 : index
    %c0_10 = arith.constant 0 : index
    %c0_11 = arith.constant 0 : index
    %9 = vector.load %arg4[%c0_9, %c0_10, %c0_11] : memref<2x1x128xf32, #tpu.memory_space<vmem>>, vector<1x1x128xf32>
    %10 = vector.shape_cast %9 : vector<1x1x128xf32> to vector<1x128xf32>
    %11 = vector.broadcast %10 : vector<1x128xf32> to vector<16x128xf32>
    %12 = arith.addf %8, %11 : vector<16x128xf32>
    %cst_12 = arith.constant 0.000000e+00 : f32
    %13 = vector.broadcast %cst_12 : f32 to vector<16x128xf32>
    %14 = arith.maximumf %12, %13 : vector<16x128xf32>
    %c1 = arith.constant 1 : index
    %c0_13 = arith.constant 0 : index
    %c0_14 = arith.constant 0 : index
    %15 = vector.load %arg3[%c1, %c0_13, %c0_14] : memref<2x128x128xf32, #tpu.memory_space<vmem>>, vector<1x128x128xf32>
    %16 = vector.shape_cast %15 : vector<1x128x128xf32> to vector<128x128xf32>
    %cst_15 = arith.constant dense<0.000000e+00> : vector<16x128xf32>
    %17 = tpu.matmul %14, %16, %cst_15 {dimension_numbers = #tpu.dot_dimension_numbers<[1], [0], [0], [1], [0, 0, 1, 1], [], []>} : vector<16x128xf32>, vector<128x128xf32>, vector<16x128xf32> -> vector<16x128xf32>
    %18 = vector.shape_cast %17 : vector<16x128xf32> to vector<2x8x128xf32>
    "tpu.trace_start"() <{level = 10 : i32, message = "bnm,bme->bne"}> : () -> ()
    %cst_16 = arith.constant dense<0.000000e+00> : vector<2x8x128xf32>
    %19 = tpu.matmul %0, %18, %cst_16 {dimension_numbers = #tpu.dot_dimension_numbers<[2], [1], [1], [2], [0, 0, 0, 1, 1, 2], [0], [0]>} : vector<2x8x8xf32>, vector<2x8x128xf32>, vector<2x8x128xf32> -> vector<2x8x128xf32>
    "tpu.trace_stop"() : () -> ()
    %20 = vector.shape_cast %19 : vector<2x8x128xf32> to vector<16x128xf32>
    %c1_17 = arith.constant 1 : index
    %c0_18 = arith.constant 0 : index
    %c0_19 = arith.constant 0 : index
    %21 = vector.load %arg4[%c1_17, %c0_18, %c0_19] : memref<2x1x128xf32, #tpu.memory_space<vmem>>, vector<1x1x128xf32>
    %22 = vector.shape_cast %21 : vector<1x1x128xf32> to vector<1x128xf32>
    %23 = vector.broadcast %22 : vector<1x128xf32> to vector<16x128xf32>
    %24 = arith.addf %20, %23 : vector<16x128xf32>
    %cst_20 = arith.constant 0.000000e+00 : f32
    %25 = vector.broadcast %cst_20 : f32 to vector<16x128xf32>
    %26 = arith.maximumf %24, %25 : vector<16x128xf32>
    %27 = vector.shape_cast %26 : vector<16x128xf32> to vector<2x8x128xf32>
    %c0_21 = arith.constant 0 : index
    %c0_22 = arith.constant 0 : index
    %c0_23 = arith.constant 0 : index
    %28 = vector.load %arg5[%c0_21, %c0_22, %c0_23] : memref<2x8x128xf32, #tpu.memory_space<vmem>>, vector<2x8x128xf32>
    tpu.vector_store %arg5[%c0_21, %c0_22, %c0_23], %27 {strides = array<i32>} : memref<2x8x128xf32, #tpu.memory_space<vmem>>, vector<2x8x128xf32>,
    return
  }
  func.func @transform_0(%arg0: i32) -> (i32, i32, i32) {
    %c0_i32 = arith.constant 0 : i32
    %c0_i32_0 = arith.constant 0 : i32
    %c0_i32_1 = arith.constant 0 : i32
    %c0_i32_2 = arith.constant 0 : i32
    return %c0_i32, %c0_i32_0, %c0_i32_1 : i32, i32, i32
  }
  func.func @transform_1(%arg0: i32) -> (i32, i32, i32) {
    %c0_i32 = arith.constant 0 : i32
    %c0_i32_0 = arith.constant 0 : i32
    %c0_i32_1 = arith.constant 0 : i32
    %c0_i32_2 = arith.constant 0 : i32
    return %c0_i32, %c0_i32_0, %c0_i32_1 : i32, i32, i32
  }
  func.func @transform_2(%arg0: i32) -> (i32, i32, i32) {
    %c0_i32 = arith.constant 0 : i32
    %c0_i32_0 = arith.constant 0 : i32
    %c0_i32_1 = arith.constant 0 : i32
    %c0_i32_2 = arith.constant 0 : i32
    return %c0_i32, %c0_i32_0, %c0_i32_1 : i32, i32, i32
  }
  func.func @transform_3(%arg0: i32) -> (i32, i32, i32) {
    %c0_i32 = arith.constant 0 : i32
    %c0_i32_0 = arith.constant 0 : i32
    %c0_i32_1 = arith.constant 0 : i32
    %c0_i32_2 = arith.constant 0 : i32
    return %c0_i32, %c0_i32_0, %c0_i32_1 : i32, i32, i32
  }
  func.func @transform_4(%arg0: i32) -> (i32, i32, i32) {
    %c0_i32 = arith.constant 0 : i32
    %c0_i32_0 = arith.constant 0 : i32
    %c0_i32_1 = arith.constant 0 : i32
    %c0_i32_2 = arith.constant 0 : i32
    return %c0_i32, %c0_i32_0, %c0_i32_1 : i32, i32, i32
  }
}

</mosaic_0001>

<bundles_post_ra>
// kernel: graph_forward.1
= control target key start
LH: loop header
LB: loop body
LE: loop exit
PB: predicated region body
PF: predicated region fallthrough
CT: control target
= control target key end

     0   :  { %s959_s0 = inlined_call_operand.vmem [shape: f32[2,8,128], index: 0, kind: input, shape index: {}]   ;;  %s960_s1 = inlined_call_operand.vmem [shape: f32[2,8,8], index: 1, kind: input, shape index: {}]   ;;  %s961_s2 = inlined_call_operand.vmem [shape: f32[2,128,128], index: 2, kind: input, shape index: {}]   ;;  %s962_s3 = inlined_call_operand.vmem [shape: f32[2,1,128], index: 3, kind: input, shape index: {}]   ;;  %s963_s4 = inlined_call_operand.hbm [shape: f32[2,8,128], index: 4, kind: output, shape index: {}]  }
   0x1   :  { %v22_v0 = vld [vmem:[%s961_s2] sm:$0xff]  ;;  %v23_v1 = vld [vmem:[%s961_s2 + $0x8] sm:$0xff]  ;;  %v24_v2 = vld [vmem:[%s961_s2 + $0x10] sm:$0xff] }
   0x2   :  { %v690_v3 = vpack.c.bf16 %v23_v1, %v22_v0  ;;  %v25_v4 = vld [vmem:[%s961_s2 + $0x18] sm:$0xff]  ;;  %v26_v6 = vld [vmem:[%s961_s2 + $0x20] sm:$0xff]  ;;  %v27_v7 = vld [vmem:[%s961_s2 + $0x28] sm:$0xff] }
   0x3   :  { %v694_v5 = vpack.c.bf16 %v25_v4, %v24_v2  ;;  %v698_v8 = vpack.c.bf16 %v27_v7, %v26_v6  ;;  %v20_v9 = vld [vmem:[%s959_s0] sm:$0xff]  ;;  %v28_v10 = vld [vmem:[%s961_s2 + $0x30] sm:$0xff]  ;;  %v29_v11 = vld [vmem:[%s961_s2 + $0x38] sm:$0xff] }
   0x4   :  { %691 = vmatprep.subr.bf16.mxu0 %v690_v3  ;;  %632 = vmatprep.mubr.f32.mxu0 %v20_v9 }
   0x5   :  { %693 = vmatpush3.bf16.msra.mxu0 %v690_v3 }
   0x6   :  { %695 = vmatprep.subr.bf16.mxu0 %v694_v5 }
   0x7   :  { %9 = vsyncpa [#allocation3], 0  ;;  %v702_v12 = vpack.c.bf16 %v29_v11, %v28_v10  ;;  %v30_v13 = vld [vmem:[%s961_s2 + $0x40] sm:$0xff]  ;;  %v31_v14 = vld [vmem:[%s961_s2 + $0x48] sm:$0xff]  ;;  %v783_v26 = vmov 0.0   ;;  %vm784_vm0 = vmmov 0  }
   0x8   :  { %v706_v15 = vpack.c.bf16 %v31_v14, %v30_v13  ;;  %v32_v16 = vld [vmem:[%s961_s2 + $0x50] sm:$0xff]  ;;  %v33_v17 = vld [vmem:[%s961_s2 + $0x58] sm:$0xff]  ;;  %v34_v19 = vld [vmem:[%s961_s2 + $0x60] sm:$0xff]  ;;  %635 = vmatprep.subr.mxu1 %v783_v26  ;;  %637 = vmatprep.mubr.msk.f32.mxu1 %vm784_vm0, %v783_v26  ;;  %vm113_vm1 = vcmask 64512   ;;  %s785_s9 = smov [#allocation2]  }
   0x9   :  { %697 = vmatpush3.bf16.msra.mxu0 %v694_v5  ;;  %v710_v18 = vpack.c.bf16 %v33_v17, %v32_v16  ;;  %v35_v20 = vld [vmem:[%s961_s2 + $0x68] sm:$0xff]  ;;  %v36_v22 = vld [vmem:[%s961_s2 + $0x70] sm:$0xff]  ;;  %v37_v23 = vld [vmem:[%s961_s2 + $0x78] sm:$0xff]  ;;  %s522_s10 = sshll.u32 %s785_s9, 4  ;;  %s523_s10 = int_to_ptr.vmem [resolvable:$true] %s522_s10 }
   0xa   :  { %699 = vmatprep.subr.bf16.mxu0 %v698_v8  ;;  %v714_v21 = vpack.c.bf16 %v35_v20, %v34_v19  ;;  %v718_v24 = vpack.c.bf16 %v37_v23, %v36_v22  ;;  %v21_v25 = vld [vmem:[%s959_s0 + $0x8] sm:$0xff]  ;;  %v536_v27 = vld [vmem:[%s961_s2 + $0x80] sm:$0xff]  ;;  %v538_v33 = vld [vmem:[%s961_s2 + $0x90] sm:$0xff]  ;;  %s759_s11 = scalar_lea.vmem %s523_s10, 256  ;;  %p764_p1 = scmp.lt.s32.totalorder %s523_s10, %s523_s10 }
   0xb   :  { %v537_v28 = vld [vmem:[%s961_s2 + $0x88] sm:$0xff]  ;;  %v882_v30 = vld [vmem:[%s960_s1] sm:$0xff]  ;;  %v539_v34 = vld [vmem:[%s961_s2 + $0x98] sm:$0xff]  ;;  %p760_p0 = scmp.ne.s32.totalorder %s523_s10, %s759_s11  ;;  %p765_p2 = scmp.lt.s32.totalorder %s759_s11, %s759_s11 }
   0xc   :  { %v722_v32 = vpack.c.bf16 %v537_v28, %v536_v27  ;;  %v19_v35 = vld [vmem:[%s960_s1 + $0x8] sm:$0xff]  ;;  %v726_v36 = vpack.c.bf16 %v539_v34, %v538_v33  ;;  %v540_v37 = vld [vmem:[%s961_s2 + $0xa0] sm:$0xff]  ;;  %v542_v40 = vld [vmem:[%s961_s2 + $0xb0] sm:$0xff] }
   0xd   :  { %701 = vmatpush3.bf16.msra.mxu0 %v698_v8  ;;  %v541_v38 = vld [vmem:[%s961_s2 + $0xa8] sm:$0xff]  ;;  %v543_v41 = vld [vmem:[%s961_s2 + $0xb8] sm:$0xff]  ;;  %v544_v43 = vld [vmem:[%s961_s2 + $0xc0] sm:$0xff]  ;;  %p766_p3 = por %p765_p2, %p764_p1 }
   0xe   :  { %703 = vmatprep.subr.bf16.mxu0 %v702_v12  ;;  %v730_v39 = vpack.c.bf16 %v541_v38, %v540_v37  ;;  %v734_v42 = vpack.c.bf16 %v543_v41, %v542_v40  ;;  %v545_v44 = vld [vmem:[%s961_s2 + $0xc8] sm:$0xff]  ;;  %v546_v46 = vld [vmem:[%s961_s2 + $0xd0] sm:$0xff]  ;;  %v547_v47 = vld [vmem:[%s961_s2 + $0xd8] sm:$0xff] }
   0xf   :  { %v738_v45 = vpack.c.bf16 %v545_v44, %v544_v43  ;;  %v742_v48 = vpack.c.bf16 %v547_v47, %v546_v46  ;;  %v548_v49 = vld [vmem:[%s961_s2 + $0xe0] sm:$0xff]  ;;  %v549_v50 = vld [vmem:[%s961_s2 + $0xe8] sm:$0xff]  ;;  %v550_v52 = vld [vmem:[%s961_s2 + $0xf0] sm:$0xff]  ;;  %p767_p4 = pnand %p766_p3, %p760_p0 }
  0x10   :  { %v746_v51 = vpack.c.bf16 %v549_v50, %v548_v49  ;;  %v551_v53 = vld [vmem:[%s961_s2 + $0xf8] sm:$0xff]  ;;  %v535_v55 = vld [vmem:[%s962_s3] ss:$0 sm:$0xff]  ;;  %v555_v2 = vld [vmem:[%s962_s3 + $0x1] ss:$0 sm:$0xff] }
  0x11   :  { %705 = vmatpush3.bf16.msra.mxu0 %v702_v12  ;;  %v750_v54 = vpack.c.bf16 %v551_v53, %v550_v52 }
  0x12   :  { %707 = vmatprep.subr.bf16.mxu0 %v706_v15 }
  0x15   :  { %709 = vmatpush3.bf16.msra.mxu0 %v706_v15 }
  0x16   :  { %711 = vmatprep.subr.bf16.mxu0 %v710_v18 }
  0x19   :  { %713 = vmatpush3.bf16.msra.mxu0 %v710_v18 }
  0x1a   :  { %715 = vmatprep.subr.bf16.mxu0 %v714_v21 }
  0x1d   :  { %717 = vmatpush3.bf16.msra.mxu0 %v714_v21 }
  0x1e   :  { %719 = vmatprep.subr.bf16.mxu0 %v718_v24 }
  0x21   :  { %721 = vmatpush3.bf16.msra.mxu0 %v718_v24 }
  0x22   :  { %680 = vmatprep.subr.mxu0 %v783_v26 }
  0x24   :  { %633 = vmatmul.mubr.f32.vlgmr.msra.gmra.mrb[0].mxu0 %v21_v25 }
  0x25   :  { %682 = vmatprep.mubr.msk.f32.mxu0 %vm784_vm0, %v783_v26 }
  0xf7   :  { %v634_v29 = vpop.f32.mrb[0].mxu0 }
  0xf8   :  { %v104_v31 = vpop.f32.mrb[1].mxu0 }
  0xf9   :  { %636 = vmatpush3.msra.mxu1 %v104_v31 }
  0xfa   :  { %638 = vmatmul.mubr.msk.f32.vlgmr.msra.gmra.mrb[0].mxu1 %vm113_vm1, %v882_v30  ;;  %640 = vmatprep.subr.mxu1 %v783_v26 }
  0xfb   :  { %641 = vmatpush3.msra.mxu1 %v634_v29  ;;  %642 = vmatprep.mubr.msk.f32.mxu1 %vm784_vm0, %v783_v26 }
  0xfc   :  { %723 = vmatprep.subr.bf16.mxu1 %v722_v32 }
  0xfe   :  { %643 = vmatmul.mubr.msk.f32.vlgmr.msra.gmra.mrb[2].mxu1 %vm113_vm1, %v19_v35 }
  0xff   :  { %725 = vmatpush3.bf16.msra.mxu1 %v722_v32 }
 0x100   :  { %727 = vmatprep.subr.bf16.mxu1 %v726_v36 }
 0x103   :  { %729 = vmatpush3.bf16.msra.mxu1 %v726_v36 }
 0x104   :  { %731 = vmatprep.subr.bf16.mxu1 %v730_v39 }
 0x107   :  { %733 = vmatpush3.bf16.msra.mxu1 %v730_v39 }
 0x108   :  { %735 = vmatprep.subr.bf16.mxu1 %v734_v42 }
 0x10b   :  { %737 = vmatpush3.bf16.msra.mxu1 %v734_v42 }
 0x10c   :  { %739 = vmatprep.subr.bf16.mxu1 %v738_v45 }
 0x10f   :  { %741 = vmatpush3.bf16.msra.mxu1 %v738_v45 }
 0x110   :  { %743 = vmatprep.subr.bf16.mxu1 %v742_v48 }
 0x113   :  { %745 = vmatpush3.bf16.msra.mxu1 %v742_v48 }
 0x114   :  { %747 = vmatprep.subr.bf16.mxu1 %v746_v51 }
 0x117   :  { %749 = vmatpush3.bf16.msra.mxu1 %v746_v51 }
 0x118   :  { %751 = vmatprep.subr.bf16.mxu1 %v750_v54 }
 0x11b   :  { %753 = vmatpush3.bf16.msra.mxu1 %v750_v54 }
 0x1cd   :  { %v183_v56 = vpop.f32.mrb[0].mxu1 }
 0x1ce   :  { %v267_v57 = vadd.f32 %v535_v55, %v183_v56  ;;  %v639_v58 = vpop.f32.mrb[1].mxu1 }
 0x1d0   :  { %v269_v59 = vmax.f32 %v267_v57, 0.0 }
 0x1d1   :  { %v256_v60 = vpop.f32.mrb[2].mxu1 }
 0x1d2   :  { %v268_v61 = vadd.f32 %v535_v55, %v256_v60  ;;  %v644_v62 = vpop.f32.mrb[3].mxu1  ;;  %677 = vmatprep.mubr.f32.mxu1 %v269_v59 }
 0x1d4   :  { %v270_v63 = vmax.f32 %v268_v61, 0.0 }
 0x1d6   :  { %678 = vmatmul.mubr.f32.vlgmr.msra.gmra.mrb[4].mxu1 %v270_v63 }
 0x2a9   :  { %v679_v0 = vpop.f32.mrb[4].mxu1 }
 0x2aa   :  { %v354_v1 = vpop.f32.mrb[5].mxu1 }
 0x2ab   :  { %681 = vmatpush3.msra.mxu0 %v354_v1 }
 0x2ac   :  { %685 = vmatprep.subr.mxu0 %v783_v26  ;;  %683 = vmatmul.mubr.msk.f32.vlgmr.msra.gmra.mrb[2].mxu0 %vm113_vm1, %v882_v30 }
 0x2ad   :  { %686 = vmatpush3.msra.mxu0 %v679_v0  ;;  %687 = vmatprep.mubr.msk.f32.mxu0 %vm784_vm0, %v783_v26 }
 0x2b0   :  { %688 = vmatmul.mubr.msk.f32.vlgmr.msra.gmra.mrb[4].mxu0 %vm113_vm1, %v19_v35 }
 0x37f   :  { %v429_v3 = vpop.f32.mrb[2].mxu0 }
 0x380   :  { %v511_v4 = vadd.f32 %v555_v2, %v429_v3  ;;  %v684_v5 = vpop.f32.mrb[3].mxu0 }
 0x382   :  { %v513_v6 = vmax.f32 %v511_v4, 0.0 }
 0x383   :  { %v499_v7 = vpop.f32.mrb[4].mxu0 }
 0x384   :  { %515 = vst [vmem:[#allocation2] sm:$0xff] %v513_v6  ;;  %v512_v8 = vadd.f32 %v555_v2, %v499_v7  ;;  %v689_v9 = vpop.f32.mrb[5].mxu0 }
 0x386   :  { %v514_v10 = vmax.f32 %v512_v8, 0.0 }
 0x388   :  { %516 = vst [vmem:[#allocation2 + $0x8] sm:$0xff] %v514_v10 }
 0x389   :  { %770 = shalt.err (!%p767_p4)
}
 0x38a   :  { %s771_s13 = scalar_lea.hbm %s963_s4, 256 }
 0x38b   :  { %p772_p5 = scmp.ne.s32.totalorder %s963_s4, %s771_s13  ;;  %p775_p6 = scmp.lt.u32.totalorder %s771_s13, %s963_s4 }
 0x38d   :  { %p777_p7 = pnand %p775_p6, %p772_p5 }
 0x38f   :  { %780 = shalt.err (!%p777_p7)
}
 0x390   :  { %s786_s17 = smov 128   ;;  %s787_s18 = smov 8  }
 0x391   :  { %528 = dma.vmem_to_hbm [thread:$0]  %s523_s10, 256, %s963_s4, [#allocation3], %s786_s17, %s786_s17, %s787_s18  }
 0x392   :  { %781 = dma.done.wait [#allocation3], 256  }
 0x393   :  { %782 = vsyncadd [#allocation3], 4294967040 }
 0x394   :  { %532 = vsyncpa [#allocation3], 1 }

</bundles_post_ra>
